<compile_context>
chip_gen: v6e
topology: v6e:2x2x1
jax: 0.10.0
libtpu: 0.0.40
codegen_flags: <defaults>
</compile_context>

<pallas_src>
import functools

import jax
import jax.numpy as jnp
from jax.experimental import pallas as pl
from jax.experimental.pallas import tpu as pltpu

SUBLANE = 8


def _round_up(x, m):
    return ((x + m - 1) // m) * m


def resblock_kernel(x_ref, w1_ref, b1_ref, w2_ref, b2_ref, o_ref):
    # x tile is f32 [TM, D]; weights are bf16 [D, D]; biases f32 [1, D].
    x = x_ref[...]
    h = jnp.maximum(x, 0.0)                                          # ReLU (f32 VPU)
    h = jnp.dot(h.astype(jnp.bfloat16), w1_ref[...],                 # bf16 x bf16 -> f32 acc
                preferred_element_type=jnp.float32) + b1_ref[...]
    h = jnp.maximum(h, 0.0)                                          # ReLU
    h = jnp.dot(h.astype(jnp.bfloat16), w2_ref[...],
                preferred_element_type=jnp.float32) + b2_ref[...]
    o_ref[...] = (x + h).astype(o_ref.dtype)                         # residual add, f32 store


def prepare_resblock_params(w1, b1, w2, b2):
    """One-time prep, hoisted out of the per-call path.

    PyTorch nn.Linear weights are [out, in]; transpose to [in, out] so the kernel
    computes x @ W on the MXU, and cast to bf16 (native MXU operand dtype).  Biases
    stay f32 (added to the f32 accumulator).
    """
    out_size, in_size = w1.shape
    assert in_size == out_size, "residual add requires in_size == out_size"
    w1_t = jnp.asarray(w1, jnp.float32).T.astype(jnp.bfloat16)
    w2_t = jnp.asarray(w2, jnp.float32).T.astype(jnp.bfloat16)
    b1_r = jnp.asarray(b1, jnp.float32).reshape(1, -1)
    b2_r = jnp.asarray(b2, jnp.float32).reshape(1, -1)
    return (w1_t, b1_r, w2_t, b2_r)


def _resident_spec(shape):
    # Weight/bias block index never changes across grid steps; single-buffer it so it
    # doesn't waste a second VMEM copy (matters on v7x once d grows).
    index_map = lambda i: (0, 0)
    try:
        return pl.BlockSpec(shape, index_map, pipeline_mode=pl.Buffered(1))
    except TypeError:  # older BlockSpec without pipeline_mode
        return pl.BlockSpec(shape, index_map)


def resblock_forward(x, params, *, block_rows=1024):
    """x: [B, d] f32.  Returns x + Linear2(ReLU(Linear1(ReLU(x)))), matching the module."""
    w1_t, b1_r, w2_t, b2_r = params
    B, d = x.shape
    assert w1_t.shape == (d, d)

    # Batch tile: large enough to amortize the ~0.35 us per-step pipeline overhead, but
    # capped so the batch grid has >= 2 steps whenever B allows (v7x has 2 TensorCores
    # and shards the "parallel" axis across them).
    tm = max(SUBLANE, min(block_rows, _round_up(pl.cdiv(B, 2), SUBLANE)))
    grid = (pl.cdiv(B, tm),)   # ragged last tile: Pallas masks the out-of-bounds rows

    # Feature axis stays at d (block dim == full array dim is legal), so activation HBM
    # traffic is not inflated by lane padding; the compiler pads to lanes inside VMEM.
    row_spec = pl.BlockSpec((tm, d), lambda i: (i, 0))

    cost = pl.CostEstimate(
        flops=4 * B * d * d + 2 * B * d,                  # two matmuls + two bias adds
        transcendentals=0,
        bytes_accessed=(2 * B * d * 4                     # x read + out write (f32)
                        + 2 * d * d * 2                   # bf16 weights
                        + 2 * d * 4),                     # f32 biases
    )

    return pl.pallas_call(
        resblock_kernel,
        out_shape=jax.ShapeDtypeStruct((B, d), x.dtype),
        grid=grid,
        in_specs=[
            row_spec,                 # x tiles, pipelined over the batch
            _resident_spec((d, d)),   # W1^T (bf16, VMEM-resident)
            _resident_spec((1, d)),   # b1
            _resident_spec((d, d)),   # W2^T
            _resident_spec((1, d)),   # b2
        ],
        out_specs=row_spec,
        compiler_params=pltpu.CompilerParams(
            dimension_semantics=("parallel",),   # batch axis shardable across v7x TCs
            vmem_limit_bytes=32 << 20,           # safe everywhere incl. v7x; tiles are tiny
        ),
        cost_estimate=cost,
    )(x, w1_t, b1_r, w2_t, b2_r)


if __name__ == "__main__":
    # Small shapes implied by the module: batch=8, in_size=out_size=32.
    B, D = 8, 32
    key = jax.random.PRNGKey(0)
    kx, kw1, kb1, kw2, kb2, kx2 = jax.random.split(key, 6)

    bound = 1.0 / (D ** 0.5)  # PyTorch nn.Linear default init range
    x = jax.random.normal(kx, (B, D), dtype=jnp.float32)
    w1 = jax.random.uniform(kw1, (D, D), minval=-bound, maxval=bound, dtype=jnp.float32)
    b1 = jax.random.uniform(kb1, (D,), minval=-bound, maxval=bound, dtype=jnp.float32)
    w2 = jax.random.uniform(kw2, (D, D), minval=-bound, maxval=bound, dtype=jnp.float32)
    b2 = jax.random.uniform(kb2, (D,), minval=-bound, maxval=bound, dtype=jnp.float32)

    # Weight prep (transpose + bf16 cast) is done once, outside the per-call path.
    params = prepare_resblock_params(w1, b1, w2, b2)
    fwd = jax.jit(resblock_forward)

    def ref_fn(xv):
        h = jnp.maximum(xv, 0.0) @ w1.T + b1
        h = jnp.maximum(h, 0.0) @ w2.T + b2
        return xv + h

    out = jax.block_until_ready(fwd(x, params))
    assert out.shape == (B, D) and out.dtype == jnp.float32
    assert jnp.allclose(out, ref_fn(x), atol=2e-2, rtol=2e-2), \
        "small-batch path mismatch vs reference"

    # Larger batch: exercises the multi-step (>=2, v7x-friendly) grid and the masked
    # ragged last tile (no wrapper-side padding or slicing).
    B2 = 300
    x2 = jax.random.normal(kx2, (B2, D), dtype=jnp.float32)
    out2 = jax.block_until_ready(fwd(x2, params))
    assert out2.shape == (B2, D)
    assert jnp.allclose(out2, ref_fn(x2), atol=2e-2, rtol=2e-2), \
        "ragged-grid path mismatch vs reference"

    print("KERNEL_OK")
</pallas_src>

<mosaic_0001>
module attributes {stable_mosaic.version = 11 : i64} {
  func.func @resblock_kernel(%arg0: i32, %arg1: memref<8x32xf32, #tpu.memory_space<vmem>>, %arg2: memref<32x32xbf16, #tpu.memory_space<vmem>>, %arg3: memref<1x32xf32, #tpu.memory_space<vmem>>, %arg4: memref<32x32xbf16, #tpu.memory_space<vmem>>, %arg5: memref<1x32xf32, #tpu.memory_space<vmem>>, %arg6: memref<8x32xf32, #tpu.memory_space<vmem>>) attributes {dimension_semantics = [#tpu.dimension_semantics<parallel>], iteration_bounds = array<i64: 1>, scalar_prefetch = 0 : i64, scratch_operands = 0 : i64, tpu.core_type = #tpu.core_type<tc>, window_params = [{transform_indices = @transform_0, window_bounds = array<i64: 8, 32>}, {pipeline_mode = #tpu.pipeline_mode<synchronous>, transform_indices = @transform_1, window_bounds = array<i64: 32, 32>}, {pipeline_mode = #tpu.pipeline_mode<synchronous>, transform_indices = @transform_2, window_bounds = array<i64: 1, 32>}, {pipeline_mode = #tpu.pipeline_mode<synchronous>, transform_indices = @transform_3, window_bounds = array<i64: 32, 32>}, {pipeline_mode = #tpu.pipeline_mode<synchronous>, transform_indices = @transform_4, window_bounds = array<i64: 1, 32>}, {transform_indices = @transform_5, window_bounds = array<i64: 8, 32>}]} {
    %c0 = arith.constant 0 : index
    %c0_0 = arith.constant 0 : index
    %0 = vector.load %arg1[%c0, %c0_0] : memref<8x32xf32, #tpu.memory_space<vmem>>, vector<8x32xf32>
    %cst = arith.constant 0.000000e+00 : f32
    %1 = vector.broadcast %cst : f32 to vector<8x32xf32>
    %2 = arith.maximumf %0, %1 : vector<8x32xf32>
    %3 = arith.truncf %2 : vector<8x32xf32> to vector<8x32xbf16>
    %c0_1 = arith.constant 0 : index
    %c0_2 = arith.constant 0 : index
    %4 = vector.load %arg2[%c0_1, %c0_2] : memref<32x32xbf16, #tpu.memory_space<vmem>>, vector<32x32xbf16>
    %cst_3 = arith.constant dense<0.000000e+00> : vector<8x32xf32>
    %5 = tpu.matmul %3, %4, %cst_3 {dimension_numbers = #tpu.dot_dimension_numbers<[1], [0], [0], [1], [0, 0, 1, 1], [], []>} : vector<8x32xbf16>, vector<32x32xbf16>, vector<8x32xf32> -> vector<8x32xf32>
    %c0_4 = arith.constant 0 : index
    %c0_5 = arith.constant 0 : index
    %6 = vector.load %arg3[%c0_4, %c0_5] : memref<1x32xf32, #tpu.memory_space<vmem>>, vector<1x32xf32>
    %7 = vector.broadcast %6 : vector<1x32xf32> to vector<8x32xf32>
    %8 = arith.addf %5, %7 : vector<8x32xf32>
    %cst_6 = arith.constant 0.000000e+00 : f32
    %9 = vector.broadcast %cst_6 : f32 to vector<8x32xf32>
    %10 = arith.maximumf %8, %9 : vector<8x32xf32>
    %11 = arith.truncf %10 : vector<8x32xf32> to vector<8x32xbf16>
    %c0_7 = arith.constant 0 : index
    %c0_8 = arith.constant 0 : index
    %12 = vector.load %arg4[%c0_7, %c0_8] : memref<32x32xbf16, #tpu.memory_space<vmem>>, vector<32x32xbf16>
    %cst_9 = arith.constant dense<0.000000e+00> : vector<8x32xf32>
    %13 = tpu.matmul %11, %12, %cst_9 {dimension_numbers = #tpu.dot_dimension_numbers<[1], [0], [0], [1], [0, 0, 1, 1], [], []>} : vector<8x32xbf16>, vector<32x32xbf16>, vector<8x32xf32> -> vector<8x32xf32>
    %c0_10 = arith.constant 0 : index
    %c0_11 = arith.constant 0 : index
    %14 = vector.load %arg5[%c0_10, %c0_11] : memref<1x32xf32, #tpu.memory_space<vmem>>, vector<1x32xf32>
    %15 = vector.broadcast %14 : vector<1x32xf32> to vector<8x32xf32>
    %16 = arith.addf %13, %15 : vector<8x32xf32>
    %17 = arith.addf %0, %16 : vector<8x32xf32>
    %c0_12 = arith.constant 0 : index
    %c0_13 = arith.constant 0 : index
    %18 = vector.load %arg6[%c0_12, %c0_13] : memref<8x32xf32, #tpu.memory_space<vmem>>, vector<8x32xf32>
    tpu.vector_store %arg6[%c0_12, %c0_13], %17 {strides = array<i32>} : memref<8x32xf32, #tpu.memory_space<vmem>>, vector<8x32xf32>,
    return
  }
  func.func @transform_0(%arg0: i32) -> (i32, i32) {
    %c0_i32 = arith.constant 0 : i32
    %c0_i32_0 = arith.constant 0 : i32
    return %arg0, %c0_i32 : i32, i32
  }
  func.func @transform_1(%arg0: i32) -> (i32, i32) {
    %c0_i32 = arith.constant 0 : i32
    %c0_i32_0 = arith.constant 0 : i32
    %c0_i32_1 = arith.constant 0 : i32
    return %c0_i32, %c0_i32_0 : i32, i32
  }
  func.func @transform_2(%arg0: i32) -> (i32, i32) {
    %c0_i32 = arith.constant 0 : i32
    %c0_i32_0 = arith.constant 0 : i32
    %c0_i32_1 = arith.constant 0 : i32
    return %c0_i32, %c0_i32_0 : i32, i32
  }
  func.func @transform_3(%arg0: i32) -> (i32, i32) {
    %c0_i32 = arith.constant 0 : i32
    %c0_i32_0 = arith.constant 0 : i32
    %c0_i32_1 = arith.constant 0 : i32
    return %c0_i32, %c0_i32_0 : i32, i32
  }
  func.func @transform_4(%arg0: i32) -> (i32, i32) {
    %c0_i32 = arith.constant 0 : i32
    %c0_i32_0 = arith.constant 0 : i32
    %c0_i32_1 = arith.constant 0 : i32
    return %c0_i32, %c0_i32_0 : i32, i32
  }
  func.func @transform_5(%arg0: i32) -> (i32, i32) {
    %c0_i32 = arith.constant 0 : i32
    %c0_i32_0 = arith.constant 0 : i32
    return %arg0, %c0_i32 : i32, i32
  }
}

</mosaic_0001>

<bundles_post_ra>
// kernel: resblock_forward.1
= control target key start
LH: loop header
LB: loop body
LE: loop exit
PB: predicated region body
PF: predicated region fallthrough
CT: control target
= control target key end

     0   :  { %10 = vsyncpa [#allocation3], 0  ;;  %s404_s0 = inlined_call_operand.hbm [shape: f32[8,32], index: 0, kind: input, shape index: {}]   ;;  %s405_s1 = inlined_call_operand.hbm [shape: bf16[32,32], index: 1, kind: input, shape index: {}]   ;;  %s406_s2 = inlined_call_operand.vmem [shape: f32[1,32], index: 2, kind: input, shape index: {}]   ;;  %s407_s3 = inlined_call_operand.hbm [shape: bf16[32,32], index: 3, kind: input, shape index: {}]   ;;  %s408_s4 = inlined_call_operand.vmem [shape: f32[1,32], index: 4, kind: input, shape index: {}]   ;;  %s409_s5 = inlined_call_operand.hbm [shape: f32[8,32], index: 5, kind: output, shape index: {}]  }
   0x1   :  { %11 = vsyncpa [#allocation6], 0 }
   0x2   :  { %12 = vsyncpa [#allocation4], 0  ;;  %s345_s18 = smov [#allocation5]  }
   0x3   :  { %s28_s19 = sshll.u32 %s345_s18, 4  ;;  %s29_s19 = int_to_ptr.vmem [resolvable:$true] %s28_s19 }
   0x4   :  { %s267_s20 = scalar_lea.vmem %s29_s19, 256  ;;  %p272_p1 = scmp.lt.s32.totalorder %s29_s19, %s29_s19 }
   0x5   :  { %p268_p0 = scmp.ne.s32.totalorder %s29_s19, %s267_s20  ;;  %p273_p2 = scmp.lt.s32.totalorder %s267_s20, %s267_s20 }
   0x7   :  { %p274_p3 = por %p273_p2, %p272_p1 }
   0x9   :  { %p275_p4 = pnand %p274_p3, %p268_p0 }
   0xb   :  { %278 = shalt.err (!%p275_p4)
}
   0xc   :  { %s346_s21 = smov 64   ;;  %s347_s22 = smov 4  }
   0xd   :  { %34 = dma.hbm_to_vmem [thread:$0]  %s405_s1, 256, %s29_s19, [#allocation6], %s346_s21, %s346_s21, %s347_s22  }
   0xe   :  { %s348_s25 = smov [#allocation2]   ;;  %s349_s27 = smov [#allocation7]  }
   0xf   :  { %s19_s26 = sshll.u32 %s348_s25, 4  ;;  %s42_s28 = sshll.u32 %s349_s27, 4  ;;  %s20_s26 = int_to_ptr.vmem [resolvable:$true] %s19_s26  ;;  %s43_s28 = int_to_ptr.vmem [resolvable:$true] %s42_s28 }
  0x10   :  { %s287_s29 = scalar_lea.vmem %s20_s26, 128  ;;  %p292_p6 = scmp.lt.s32.totalorder %s20_s26, %s20_s26 }
  0x11   :  { %p288_p5 = scmp.ne.s32.totalorder %s20_s26, %s287_s29  ;;  %p293_p7 = scmp.lt.s32.totalorder %s287_s29, %s287_s29 }
  0x13   :  { %p294_p8 = por %p293_p7, %p292_p6 }
  0x15   :  { %p295_p9 = pnand %p294_p8, %p288_p5 }
  0x17   :  { %298 = shalt.err (!%p295_p9)
}
  0x18   :  { %22 = dma.hbm_to_vmem [thread:$0]  %s404_s0, 128, %s20_s26, [#allocation3]  }
  0x19   :  { %s307_s7 = scalar_lea.vmem %s43_s28, 256  ;;  %p312_p11 = scmp.lt.s32.totalorder %s43_s28, %s43_s28 }
  0x1a   :  { %p308_p10 = scmp.ne.s32.totalorder %s43_s28, %s307_s7  ;;  %p313_p12 = scmp.lt.s32.totalorder %s307_s7, %s307_s7 }
  0x1c   :  { %p314_p13 = por %p313_p12, %p312_p11 }
  0x1e   :  { %p315_p0 = pnand %p314_p13, %p308_p10 }
  0x20   :  { %318 = shalt.err (!%p315_p0)
}
  0x21   :  { %48 = dma.hbm_to_vmem [thread:$0]  %s407_s3, 256, %s43_s28, [#allocation6], %s346_s21, %s346_s21, %s347_s22  }
  0x22   :  { %339 = dma.done.wait [#allocation3], 128  }
  0x23   :  { %340 = vsyncadd [#allocation3], 4294967168 }
  0x24   :  { %341 = dma.done.wait [#allocation6], 512  }
  0x25   :  { %342 = vsyncadd [#allocation6], 4294966784  ;;  %v350_v0 = vmov 0.0   ;;  %vm351_vm0 = vmmov 0   ;;  %v255_v1 = vld [vmem:[#allocation5 + $0x8] sm:$0xff]   ;;  %v256_v2 = vld [vmem:[#allocation5] sm:$0xff]  }
  0x26   :  { %231 = vmatprep.subr.bf16.mxu0 %v350_v0  ;;  %235 = vmatprep.mubr.msk.bf16.mxu0 %vm351_vm0, %v350_v0  ;;  %v61_v3 = vld [vmem:[#allocation2] sm:$0xff]  ;;  %vm87_vm1 = vcmask 261120   ;;  %v258_v7 = vld [vmem:[#allocation7] sm:$0xff]   ;;  %s352_s11 = smov [#allocation8]  }
  0x27   :  { %239 = vmatprep.subr.bf16.mxu1 %v350_v0  ;;  %243 = vmatprep.mubr.msk.bf16.mxu1 %vm351_vm0, %v350_v0  ;;  %v62_v4 = vmax.f32 %v61_v3, 0.0  ;;  %v257_v6 = vld [vmem:[#allocation7 + $0x8] sm:$0xff]   ;;  %s207_s12 = sshll.u32 %s352_s11, 4  ;;  %s208_s12 = int_to_ptr.vmem [resolvable:$true] %s207_s12 }
  0x28   :  { %232 = vmatpush3.bf16.msra.mxu0 %v255_v1  ;;  %240 = vmatpush3.bf16.msra.mxu1 %v257_v6  ;;  %v217_v8 = vld [vmem:[%s406_s2] ss:$0 sm:$0xff]  ;;  %s319_s2 = scalar_lea.vmem %s208_s12, 128  ;;  %p324_p2 = scmp.lt.s32.totalorder %s208_s12, %s208_s12 }
  0x29   :  { %233 = vmatprep.subr.bf16.mxu0 %v350_v0  ;;  %v63_v5 = vpack.c.bf16 %v62_v4, %v62_v4  ;;  %241 = vmatprep.subr.bf16.mxu1 %v350_v0  ;;  %v221_v16 = vld [vmem:[%s408_s4] ss:$0 sm:$0xff]  ;;  %p320_p1 = scmp.ne.s32.totalorder %s208_s12, %s319_s2  ;;  %p325_p3 = scmp.lt.s32.totalorder %s319_s2, %s319_s2 }
  0x2b   :  { %p326_p4 = por %p325_p3, %p324_p2 }
  0x2c   :  { %234 = vmatpush3.bf16.msra.mxu0 %v256_v2  ;;  %242 = vmatpush3.bf16.msra.mxu1 %v258_v7 }
  0x2d   :  { %p327_p5 = pnand %p326_p4, %p320_p1 }
  0x2f   :  { %236 = vmatmul.mubr.msk.bf16.vlgmr.msra.gmra.mxu0 %vm87_vm1, %v63_v5 }
  0xef   :  { %v125_v9 = vpop.f32.mrf.mxu0 }
  0xf0   :  { %v126_v10 = vadd.f32 %v217_v8, %v125_v9 }
  0xf1   :  { %v237_v11 = vpop.f32.mrf.mxu0 }
  0xf2   :  { %v131_v12 = vmax.f32 %v126_v10, 0.0 }
  0xf3   :  { %v128_v13 = vpop.f32.mrf.mxu0 }
  0xf4   :  { %v132_v14 = vpack.c.bf16 %v131_v12, %v131_v12 }
  0xf5   :  { %v238_v15 = vpop.f32.mrf.mxu0 }
  0xf6   :  { %244 = vmatmul.mubr.msk.bf16.vlgmr.msra.gmra.mxu1 %vm87_vm1, %v132_v14 }
 0x1b6   :  { %v193_v17 = vpop.f32.mrf.mxu1 }
 0x1b7   :  { %v194_v18 = vadd.f32 %v221_v16, %v193_v17 }
 0x1b8   :  { %v245_v19 = vpop.f32.mrf.mxu1 }
 0x1b9   :  { %v199_v20 = vadd.f32 %v194_v18, %v61_v3 }
 0x1ba   :  { %v196_v21 = vpop.f32.mrf.mxu1 }
 0x1bb   :  { %200 = vst.msk [vmem:[#allocation8] sm:$0xff] %vm87_vm1, %v199_v20 }
 0x1bc   :  { %v246_v22 = vpop.f32.mrf.mxu1 }
 0x1bd   :  { %330 = shalt.err (!%p327_p5)
}
 0x1be   :  { %210 = dma.vmem_to_hbm [thread:$0]  %s208_s12, 128, %s409_s5, [#allocation4]  }
 0x1bf   :  { %343 = dma.done.wait [#allocation4], 128  }
 0x1c0   :  { %344 = vsyncadd [#allocation4], 4294967168 }
 0x1c1   :  { %214 = vsyncpa [#allocation3], 1 }
 0x1c2   :  { %215 = vsyncpa [#allocation6], 1 }
 0x1c3   :  { %216 = vsyncpa [#allocation4], 1 }

</bundles_post_ra>
